<compile_context>
chip_gen: v7x
topology: tpu7x:2x2x1
jax: 0.10.0
libtpu: 0.0.40
codegen_flags: <defaults>
</compile_context>

<pallas_src>
import functools

import jax
import jax.numpy as jnp
from jax.experimental import pallas as pl
from jax.experimental.pallas import tpu as pltpu  # noqa: F401  (TPU backend extensions)


def _round_up(x, m):
    return (x + m - 1) // m * m


def _vqe_kernel(coefs_ref, hcat_ref, dvec_ref, out_ref):
    """eigval = sum_t coefs[t] * prod_p Re(psi_p^H H_{p,t} psi_p)."""
    num_parts = hcat_ref.shape[0]

    hcat = hcat_ref[...]                       # [P, T, F]  (F lane-dense)
    dvec = dvec_ref[...]                       # [P, F]

    # real(psi^H H_t psi) per (part, term): elementwise product + lane-only reduce.
    expval = jnp.sum(hcat * dvec[:, None, :], axis=-1)       # [P, T], T on lanes

    # running product over parts (mirrors sub_expval = sub_expval * expval_value)
    prod = expval[0:1, :]                      # [1, T]
    for p in range(1, num_parts):
        prod = prod * expval[p:p + 1, :]

    # matrix = sum(coefs * sub_expval); eigval = matrix[0][0]
    out_ref[...] = jnp.sum(coefs_ref[...] * prod, axis=-1, keepdims=True)


@jax.jit
def distributed_vqe_eigval(coefs, h_real, h_imag, psi_real, psi_imag):
    """Returns the scalar eigenvalue estimate (float32)."""
    P, T, d, _ = h_real.shape
    F = 2 * d * d

    # Lane-dense Hamiltonian: [P, T, F]  (Re block | Im block).
    hcat = jnp.concatenate(
        [h_real.reshape(P, T, d * d), h_imag.reshape(P, T, d * d)], axis=-1
    ).astype(jnp.float32)

    # Per-part density vector (tiny; fused into the same XLA program by jit):
    #   real(psi^H H psi) = sum_ij Re(H)_ij (a_i a_j + b_i b_j)
    #                     + sum_ij Im(H)_ij (b_i a_j - a_i b_j)
    a = psi_real.astype(jnp.float32)           # [P, d]
    b = psi_imag.astype(jnp.float32)           # [P, d]
    d_r = a[:, :, None] * a[:, None, :] + b[:, :, None] * b[:, None, :]   # [P, d, d]
    d_i = b[:, :, None] * a[:, None, :] - a[:, :, None] * b[:, None, :]   # [P, d, d]
    dvec = jnp.concatenate(
        [d_r.reshape(P, d * d), d_i.reshape(P, d * d)], axis=-1
    )                                           # [P, F]

    coefs2 = coefs.reshape(1, T).astype(jnp.float32)

    # Zero-pad to sublane/lane-dense shapes (neutral: padded terms/features
    # contribute exactly zero to the dot products and to the coef contraction).
    T_pad = max(_round_up(T, 8), 8)
    F_pad = max(_round_up(F, 128), 128)
    if T_pad != T or F_pad != F:
        hcat = jnp.pad(hcat, ((0, 0), (0, T_pad - T), (0, F_pad - F)))
        dvec = jnp.pad(dvec, ((0, 0), (0, F_pad - F)))
        coefs2 = jnp.pad(coefs2, ((0, 0), (0, T_pad - T)))

    out = pl.pallas_call(
        _vqe_kernel,
        out_shape=jax.ShapeDtypeStruct((1, 1), jnp.float32),
        cost_estimate=pl.CostEstimate(
            flops=2 * P * T_pad * F_pad + P * T_pad + 2 * T_pad,
            transcendentals=0,
            bytes_accessed=(P * T_pad * F_pad + P * F_pad + T_pad + 1) * 4,
        ),
    )(coefs2, hcat, dvec)
    return out[0, 0]


if __name__ == "__main__":
    key = jax.random.PRNGKey(0)
    num_qubit, num_part = 8, 2
    sub_qubit = num_qubit // num_part
    d = 2 ** sub_qubit          # 16-dim sub-statevectors
    T = 8                       # number of Hamiltonian terms after splitting

    k1, k2, k3, k4, k5 = jax.random.split(key, 5)

    # Synthetic Hermitian sub-Hamiltonians (in the original module these come from
    # sparse Pauli-string matrices of the split molecular Hamiltonian).
    a_re = jax.random.normal(k1, (num_part, T, d, d), jnp.float32)
    a_im = jax.random.normal(k2, (num_part, T, d, d), jnp.float32)
    h = a_re + 1j * a_im
    h = 0.5 * (h + jnp.conj(jnp.swapaxes(h, -1, -2)))
    h_real = jnp.real(h).astype(jnp.float32)
    h_imag = jnp.imag(h).astype(jnp.float32)

    # TODO(synk): the parametrized-circuit state preparation
    # (TorchSimulator._get_final_state on the compiled ansatz) has no clean Pallas
    # equivalent without the simulator library; synthesize normalized states instead.
    s_re = jax.random.normal(k3, (num_part, d), jnp.float32)
    s_im = jax.random.normal(k4, (num_part, d), jnp.float32)
    norm = jnp.sqrt(jnp.sum(s_re ** 2 + s_im ** 2, axis=-1, keepdims=True))
    psi_real = s_re / norm
    psi_imag = s_im / norm

    coefs = jax.random.normal(k5, (T,), jnp.float32)

    eigval = distributed_vqe_eigval(coefs, h_real, h_imag, psi_real, psi_imag)
    eigval = jax.block_until_ready(eigval)

    # pure-JAX reference mirroring the PyTorch forward semantics
    psi = (psi_real + 1j * psi_imag).astype(jnp.complex64)
    expval_ref = jnp.real(
        jnp.einsum('pi,ptij,pj->pt', jnp.conj(psi), h.astype(jnp.complex64), psi)
    )
    eig_ref = jnp.sum(coefs * jnp.prod(expval_ref, axis=0))
    assert jnp.allclose(eigval, eig_ref, atol=1e-3, rtol=1e-3), (float(eigval), float(eig_ref))

    # the module also returns the per-part final states (state_list)
    state_list = [psi[p].reshape(d, 1) for p in range(num_part)]

    print("KERNEL_OK")
</pallas_src>

<mosaic_0001>
module attributes {stable_mosaic.version = 11 : i64} {
  func.func @_vqe_kernel(%arg0: memref<1x8xf32, #tpu.memory_space<vmem>>, %arg1: memref<2x8x512xf32, #tpu.memory_space<vmem>>, %arg2: memref<2x512xf32, #tpu.memory_space<vmem>>, %arg3: memref<1x1xf32, #tpu.memory_space<vmem>>) attributes {dimension_semantics = [], scalar_prefetch = 0 : i64, scratch_operands = 0 : i64, tpu.core_type = #tpu.core_type<tc>} {
    %c0 = arith.constant 0 : index
    %c0_0 = arith.constant 0 : index
    %c0_1 = arith.constant 0 : index
    %0 = vector.load %arg1[%c0, %c0_0, %c0_1] : memref<2x8x512xf32, #tpu.memory_space<vmem>>, vector<2x8x512xf32>
    %c0_2 = arith.constant 0 : index
    %c0_3 = arith.constant 0 : index
    %1 = vector.load %arg2[%c0_2, %c0_3] : memref<2x512xf32, #tpu.memory_space<vmem>>, vector<2x512xf32>
    %2 = vector.shape_cast %1 : vector<2x512xf32> to vector<2x1x512xf32>
    %3 = vector.broadcast %2 : vector<2x1x512xf32> to vector<2x8x512xf32>
    %4 = arith.mulf %0, %3 : vector<2x8x512xf32>
    %cst = arith.constant dense<0.000000e+00> : vector<2x8xf32>
    %5 = vector.multi_reduction <add>, %4, %cst [2] : vector<2x8x512xf32> to vector<2x8xf32>
    %6 = vector.extract_strided_slice %5 {offsets = [0, 0], sizes = [1, 8], strides = [1, 1]} : vector<2x8xf32> to vector<1x8xf32>
    %7 = vector.extract_strided_slice %5 {offsets = [1, 0], sizes = [1, 8], strides = [1, 1]} : vector<2x8xf32> to vector<1x8xf32>
    %8 = arith.mulf %6, %7 : vector<1x8xf32>
    %c0_4 = arith.constant 0 : index
    %c0_5 = arith.constant 0 : index
    %9 = vector.load %arg0[%c0_4, %c0_5] : memref<1x8xf32, #tpu.memory_space<vmem>>, vector<1x8xf32>
    %10 = arith.mulf %9, %8 : vector<1x8xf32>
    %cst_6 = arith.constant dense<0.000000e+00> : vector<1xf32>
    %11 = vector.multi_reduction <add>, %10, %cst_6 [1] : vector<1x8xf32> to vector<1xf32>
    %12 = vector.shape_cast %11 : vector<1xf32> to vector<1x1xf32>
    %c0_7 = arith.constant 0 : index
    %c0_8 = arith.constant 0 : index
    %13 = vector.load %arg3[%c0_7, %c0_8] : memref<1x1xf32, #tpu.memory_space<vmem>>, vector<1x1xf32>
    tpu.vector_store %arg3[%c0_7, %c0_8], %12 {strides = array<i32>} : memref<1x1xf32, #tpu.memory_space<vmem>>, vector<1x1xf32>,
    return
  }
}

</mosaic_0001>

<bundles_post_ra>
// kernel: distributed_vqe_eigval.1
= control target key start
LH: loop header
LB: loop body
LE: loop exit
PB: predicated region body
PF: predicated region fallthrough
CT: control target
= control target key end

     0   :  { %v33_v0 = vlaneseq  ;;  %s327_s0 = inlined_call_operand.vmem [shape: f32[1,8], index: 0, kind: input, shape index: {}]   ;;  %s328_s1 = inlined_call_operand.vmem [shape: f32[2,8,512], index: 1, kind: input, shape index: {}]   ;;  %s329_s2 = inlined_call_operand.vmem [shape: f32[2,512], index: 2, kind: input, shape index: {}]   ;;  %s330_s3 = inlined_call_operand.hbm [shape: f32[1,1], index: 3, kind: output, shape index: {}]  }
   0x1   :  { %v220_v1 = vld.sshfl [vmem:[%s329_s2] sm:$0xff pattern:$0x75316420] }
   0x2   :  { %v276_v2 = vshrl.u32 %v33_v0, 7  ;;  %v32_v3 = vcombine.high %v220_v1, %v220_v1 }
   0x3   :  { %8 = vsyncpa [#allocation3], 0  ;;  %v15_v8 = vld [vmem:[%s328_s1] sm:$0xff]  ;;  %v16_v9 = vld [vmem:[%s328_s1 + $0x8] sm:$0xff]  ;;  %v250_v38 = vmov 0   ;;  %v179_v39 = vand.u32 127, %v33_v0 }
   0x4   :  { %v35_v4 = vsub.s32 0, %v276_v2  ;;  %v39_v5 = vsub.s32 1, %v276_v2  ;;  %v43_v6 = vsub.s32 2, %v276_v2  ;;  %v47_v7 = vsub.s32 3, %v276_v2  ;;  %v17_v10 = vld [vmem:[%s328_s1 + $0x10] sm:$0xff]  ;;  %v19_v15 = vld [vmem:[%s328_s1 + $0x20] sm:$0xff]  ;;  %224 = vset.pattern.permute.xlu1 %v250_v38  ;;  %225 = vset.pattern.permute.xlu0 %v250_v38 }
   0x5   :  { %v20_v16 = vld [vmem:[%s328_s1 + $0x28] sm:$0xff]  ;;  %v21_v17 = vld [vmem:[%s328_s1 + $0x30] sm:$0xff]  ;;  %v18_v18 = vld [vmem:[%s328_s1 + $0x18] sm:$0xff]  ;;  %v182_v40 = vsub.s32 %v179_v39, %v276_v2  ;;  %v251_v41 = vmov 1966171168   ;;  %v112_v46 = vsub.s32 4, %v276_v2 }
   0x6   :  { %v36_v11 = vrot.slane %v220_v1, %v35_v4  ;;  %v40_v12 = vrot.slane %v220_v1, %v39_v5  ;;  %v44_v13 = vrot.slane %v220_v1, %v43_v6  ;;  %v48_v14 = vrot.slane %v220_v1, %v47_v7  ;;  %v22_v26 = vld [vmem:[%s328_s1 + $0x38] sm:$0xff]  ;;  %s252_s30 = smov [#allocation2]  }
   0x7   :  { %v52_v19 = vrot.slane %v32_v3, %v35_v4  ;;  %v56_v20 = vrot.slane %v32_v3, %v39_v5  ;;  %v60_v21 = vrot.slane %v32_v3, %v43_v6  ;;  %v64_v25 = vrot.slane %v32_v3, %v47_v7  ;;  %s212_s4 = sshll.u32 %s252_s30, 4  ;;  %s213_s4 = int_to_ptr.vmem [resolvable:$true] %s212_s4 }
   0x8   :  { %v73_v22 = vmul.f32 %v36_v11, %v15_v8  ;;  %v74_v23 = vmul.f32 %v40_v12, %v16_v9  ;;  %v75_v24 = vmul.f32 %v44_v13, %v17_v10  ;;  %v76_v30 = vmul.f32 %v48_v14, %v18_v18  ;;  %v92_v12 = vld [vmem:[%s327_s0] sm:$0x1]  ;;  %s226_s5 = scalar_lea.vmem %s213_s4, 16  ;;  %s230_s6 = scalar_lea.vmem %s213_s4, 32 }
   0x9   :  { %v77_v27 = vmul.f32 %v52_v19, %v19_v15  ;;  %v78_v28 = vmul.f32 %v56_v20, %v20_v16  ;;  %v79_v29 = vmul.f32 %v60_v21, %v21_v17  ;;  %v80_v34 = vmul.f32 %v64_v25, %v22_v26  ;;  %p227_p0 = scmp.ne.s32.totalorder %s213_s4, %s226_s5  ;;  %p231_p1 = scmp.lt.s32.totalorder %s213_s4, %s213_s4 }
   0xa   :  { %v81_v31 = vadd.f32 %v74_v23, %v73_v22  ;;  %v131_v42 = vunpack.c.l.s4 %v251_v41  ;;  %v116_v47 = vsub.s32 5, %v276_v2  ;;  %v120_v48 = vsub.s32 6, %v276_v2  ;;  %p232_p2 = scmp.lt.s32.totalorder %s230_s6, %s226_s5 }
   0xb   :  { %v86_v32 = vadd.f32 %v78_v28, %v77_v27  ;;  %v124_v49 = vsub.s32 7, %v276_v2  ;;  %vm200_vm0 = vcmask 57344   ;;  %vm204_vm1 = vcmask 0  }
   0xc   :  { %v82_v33 = vadd.f32 %v81_v31, %v75_v24  ;;  %v132_v44 = vunpack.c.0.s8 %v131_v42  ;;  %p233_p3 = por %p232_p2, %p231_p1 }
   0xd   :  { %v87_v35 = vadd.f32 %v86_v32, %v79_v29 }
   0xe   :  { %v83_v36 = vadd.f32 %v82_v33, %v76_v30  ;;  %v135_v51 = vsub.s32 %v132_v44, %v276_v2  ;;  %p234_p4 = pnand %p233_p3, %p227_p0 }
   0xf   :  { %v88_v37 = vadd.f32 %v87_v35, %v80_v34 }
  0x10   :  { %84 = vadd.xlane.f32.xlu0 %v83_v36 }
  0x14   :  { %89 = vadd.xlane.f32.xlu0 %v88_v37 }
  0x9d   :  { %v85_v43 = vpop.xlane.xlu0 %84 }
  0xa1   :  { %v90_v45 = vpop.xlane.xlu0 %89 }
  0xa2   :  { %v91_v50 = vmul.f32 %v90_v45, %v85_v43 }
  0xa4   :  { %v97_v52 = vrot.slane %v91_v50, %v35_v4  ;;  %v101_v53 = vrot.slane %v91_v50, %v39_v5  ;;  %v105_v54 = vrot.slane %v91_v50, %v43_v6  ;;  %v109_v55 = vrot.slane %v91_v50, %v47_v7 }
  0xa5   :  { %v113_v56 = vrot.slane %v91_v50, %v112_v46  ;;  %v117_v57 = vrot.slane %v91_v50, %v116_v47  ;;  %v121_v58 = vrot.slane %v91_v50, %v120_v48  ;;  %v125_v59 = vrot.slane %v91_v50, %v124_v49 }
  0xa6   :  { %v126_v60 = vcombine.low %v97_v52, %v101_v53  ;;  %v127_v61 = vcombine.low %v105_v54, %v109_v55 }
  0xa7   :  { %v128_v62 = vcombine.low %v113_v56, %v117_v57  ;;  %v129_v63 = vcombine.low %v121_v58, %v125_v59 }
  0xa8   :  { %v136_v0 = vrot.slane %v126_v60, %v135_v51  ;;  %v143_v1 = vrot.slane %v127_v61, %v135_v51 }
  0xa9   :  { %v150_v3 = vrot.slane %v128_v62, %v135_v51  ;;  %v157_v8 = vrot.slane %v129_v63, %v135_v51 }
  0xaa   :  { %v158_v9 = vcombine.low %v136_v0, %v143_v1 }
  0xab   :  { %v159_v10 = vcombine.low %v150_v3, %v157_v8 }
  0xac   :  { %v166_v11 = vrot.slane %v158_v9, %v135_v51 }
  0xad   :  { %v173_v2 = vrot.slane %v159_v10, %v135_v51 }
  0xaf   :  { %v174_v4 = vcombine.low %v166_v11, %v173_v2 }
  0xb1   :  { %176 = vperm.xlu1 %224, %v174_v4  }
 0x130   :  { %v177_v5 = vpop.permute.xlu1 %176 }
 0x131   :  { %v183_v6 = vrot.slane %v177_v5, %v182_v40 }
 0x133   :  { %v190_v7 = vrot.slane %v183_v6, %v135_v51 }
 0x135   :  { %v197_v13 = vrot.slane %v190_v7, %v135_v51 }
 0x137   :  { %v199_v14 = vmul.f32 %v197_v13, %v92_v12 }
 0x139   :  { %v201_v15 = vsel %vm200_vm0, %v199_v14, 0.0 }
 0x13a   :  { %202 = vadd.xlane.f32.xlu1 %v201_v15 }
 0x1c7   :  { %v203_v16 = vpop.xlane.xlu1 %202 }
 0x1c8   :  { %205 = vst.msk [vmem:[#allocation2] sm:$0x1] %vm204_vm1, %v203_v16 }
 0x1c9   :  { %237 = shalt.err (!%p234_p4)
}
 0x1ca   :  { %s238_s8 = scalar_lea.hbm %s330_s3, 16 }
 0x1cb   :  { %p239_p5 = scmp.ne.s32.totalorder %s330_s3, %s238_s8  ;;  %p242_p6 = scmp.lt.u32.totalorder %s238_s8, %s330_s3 }
 0x1cd   :  { %p244_p7 = pnand %p242_p6, %p239_p5 }
 0x1cf   :  { %247 = shalt.err (!%p244_p7)
}
 0x1d0   :  { %215 = dma.vmem_to_hbm [thread:$0]  %s213_s4, 16, %s330_s3, [#allocation3]  }
 0x1d1   :  { %248 = dma.done.wait [#allocation3], 16  }
 0x1d2   :  { %249 = vsyncadd [#allocation3], 4294967280 }
 0x1d3   :  { %219 = vsyncpa [#allocation3], 1 }

</bundles_post_ra>
